<compile_context>
chip_gen: v7x
topology: tpu7x:2x2x1
jax: 0.10.0
libtpu: 0.0.40
codegen_flags: <defaults>
</compile_context>

<pallas_src>
import jax
import jax.numpy as jnp
from jax.experimental import pallas as pl
from jax.experimental.pallas import tpu as pltpu


def linear_kernel(x_ref, wb_ref, o_ref):
    # x_ref:  (B, IN)
    # wb_ref: (IN + 1, OUT)  -- rows [0:IN] = W^T, row [IN] = bias
    # o_ref:  (B, OUT)
    in_features = x_ref.shape[1]
    x = x_ref[...]
    w_t = wb_ref[:in_features, :]        # (IN, OUT), static slice
    b = wb_ref[in_features:, :]          # (1, OUT),  static slice
    y = jnp.dot(x, w_t, preferred_element_type=jnp.float32)
    o_ref[...] = (y + b).astype(o_ref.dtype)


def pack_params(weight, bias):
    """Parameter-setup-time packing: W^T stacked with the bias row.

    weight: (OUT, IN) nn.Linear layout, bias: (OUT,)
    returns: (IN + 1, OUT) buffer -> single input DMA for all parameters.
    """
    out_features = weight.shape[0]
    return jnp.concatenate(
        [weight.T, bias.reshape(1, out_features)], axis=0)


def linear_forward(x, wb):
    B, in_features = x.shape
    out_features = wb.shape[1]
    vmem = pltpu.MemorySpace.VMEM
    cost = pl.CostEstimate(
        flops=2 * B * in_features * out_features,
        transcendentals=0,
        bytes_accessed=(B * in_features
                        + (in_features + 1) * out_features
                        + B * out_features) * 4,
    )
    # Grid-less call: whole arrays resident in VMEM, single invocation,
    # two input DMAs (x, packed params) + one output DMA.
    return pl.pallas_call(
        linear_kernel,
        out_shape=jax.ShapeDtypeStruct((B, out_features), x.dtype),
        in_specs=[
            pl.BlockSpec(memory_space=vmem),
            pl.BlockSpec(memory_space=vmem),
        ],
        out_specs=pl.BlockSpec(memory_space=vmem),
        cost_estimate=cost,
    )(x, wb)


if __name__ == "__main__":
    key = jax.random.PRNGKey(0)
    kx, kw, kb = jax.random.split(key, 3)

    # Input: x1 = torch.randn(4, 4)
    x = jax.random.normal(kx, (4, 4), dtype=jnp.float32)

    # Deterministic parameter init mimicking nn.Linear(4, 8):
    # uniform(-1/sqrt(in_features), 1/sqrt(in_features))
    in_features, out_features = 4, 8
    bound = 1.0 / (in_features ** 0.5)
    weight = jax.random.uniform(
        kw, (out_features, in_features), dtype=jnp.float32,
        minval=-bound, maxval=bound)
    bias = jax.random.uniform(
        kb, (out_features,), dtype=jnp.float32, minval=-bound, maxval=bound)

    # Hoisted to parameter-setup time (one-time cost, not per call).
    wb = pack_params(weight, bias)

    out = linear_forward(x, wb)
    out = jax.block_until_ready(out)

    # Sanity check against plain JAX reference.
    ref = x @ weight.T + bias
    assert out.shape == (4, 8)
    assert jnp.allclose(out, ref, atol=1e-5, rtol=1e-5)

    print("KERNEL_OK")
</pallas_src>

<mosaic_0001>
module attributes {stable_mosaic.version = 11 : i64} {
  func.func @linear_kernel(%arg0: memref<4x4xf32, #tpu.memory_space<vmem>>, %arg1: memref<5x8xf32, #tpu.memory_space<vmem>>, %arg2: memref<4x8xf32, #tpu.memory_space<vmem>>) attributes {dimension_semantics = [], scalar_prefetch = 0 : i64, scratch_operands = 0 : i64, tpu.core_type = #tpu.core_type<tc>} {
    %c0 = arith.constant 0 : index
    %c0_0 = arith.constant 0 : index
    %0 = vector.load %arg0[%c0, %c0_0] : memref<4x4xf32, #tpu.memory_space<vmem>>, vector<4x4xf32>
    %c0_1 = arith.constant 0 : index
    %c0_2 = arith.constant 0 : index
    %1 = vector.load %arg1[%c0_1, %c0_2] : memref<5x8xf32, #tpu.memory_space<vmem>>, vector<4x8xf32>
    %c4 = arith.constant 4 : index
    %c0_3 = arith.constant 0 : index
    %2 = vector.load %arg1[%c4, %c0_3] : memref<5x8xf32, #tpu.memory_space<vmem>>, vector<1x8xf32>
    %cst = arith.constant dense<0.000000e+00> : vector<4x8xf32>
    %3 = tpu.matmul %0, %1, %cst {dimension_numbers = #tpu.dot_dimension_numbers<[1], [0], [0], [1], [0, 0, 1, 1], [], []>} : vector<4x4xf32>, vector<4x8xf32>, vector<4x8xf32> -> vector<4x8xf32>
    %4 = vector.broadcast %2 : vector<1x8xf32> to vector<4x8xf32>
    %5 = arith.addf %3, %4 : vector<4x8xf32>
    %c0_4 = arith.constant 0 : index
    %c0_5 = arith.constant 0 : index
    %6 = vector.load %arg2[%c0_4, %c0_5] : memref<4x8xf32, #tpu.memory_space<vmem>>, vector<4x8xf32>
    tpu.vector_store %arg2[%c0_4, %c0_5], %5 {strides = array<i32>} : memref<4x8xf32, #tpu.memory_space<vmem>>, vector<4x8xf32>,
    return
  }
}

</mosaic_0001>

<bundles_post_ra>
// kernel: tpu_custom_call.1
= control target key start
LH: loop header
LB: loop body
LE: loop exit
PB: predicated region body
PF: predicated region fallthrough
CT: control target
= control target key end

     0   :  { %7 = vsyncpa [#allocation3], 0  ;;  %s282_s0 = inlined_call_operand.hbm [shape: f32[4,4], index: 0, kind: input, shape index: {}]   ;;  %s283_s1 = inlined_call_operand.hbm [shape: f32[5,8], index: 1, kind: input, shape index: {}]   ;;  %s284_s2 = inlined_call_operand.hbm [shape: f32[4,8], index: 2, kind: output, shape index: {}]  }
   0x1   :  { %8 = vsyncpa [#allocation6], 0 }
   0x2   :  { %9 = vsyncpa [#allocation4], 0  ;;  %s226_s9 = smov [#allocation2]   ;;  %s227_s11 = smov [#allocation5]  }
   0x3   :  { %s16_s10 = sshll.u32 %s226_s9, 4  ;;  %s26_s12 = sshll.u32 %s227_s11, 4  ;;  %s17_s10 = int_to_ptr.vmem [resolvable:$true] %s16_s10  ;;  %s27_s12 = int_to_ptr.vmem [resolvable:$true] %s26_s12 }
   0x4   :  { %s154_s15 = scalar_lea.hbm %s282_s0, 64 }
   0x5   :  { %p155_p0 = scmp.ne.s32.totalorder %s282_s0, %s154_s15  ;;  %p158_p1 = scmp.lt.u32.totalorder %s154_s15, %s282_s0 }
   0x7   :  { %p160_p2 = pnand %p158_p1, %p155_p0 }
   0x9   :  { %163 = shalt.err (!%p160_p2)
}
   0xa   :  { %s164_s20 = scalar_lea.vmem %s17_s10, 64  ;;  %p169_p4 = scmp.lt.s32.totalorder %s17_s10, %s17_s10 }
   0xb   :  { %p165_p3 = scmp.ne.s32.totalorder %s17_s10, %s164_s20  ;;  %p170_p5 = scmp.lt.s32.totalorder %s164_s20, %s164_s20 }
   0xd   :  { %p171_p6 = por %p170_p5, %p169_p4 }
   0xf   :  { %p172_p7 = pnand %p171_p6, %p165_p3 }
  0x11   :  { %175 = shalt.err (!%p172_p7)
}
  0x12   :  { %19 = dma.hbm_to_vmem [thread:$0]  %s282_s0, 64, %s17_s10, [#allocation3]  }
  0x13   :  { %s176_s25 = scalar_lea.hbm %s283_s1, 128 }
  0x14   :  { %p177_p8 = scmp.ne.s32.totalorder %s283_s1, %s176_s25  ;;  %p180_p9 = scmp.lt.u32.totalorder %s176_s25, %s283_s1 }
  0x16   :  { %p182_p10 = pnand %p180_p9, %p177_p8 }
  0x18   :  { %185 = shalt.err (!%p182_p10)
}
  0x19   :  { %s186_s30 = scalar_lea.vmem %s27_s12, 128  ;;  %p191_p12 = scmp.lt.s32.totalorder %s27_s12, %s27_s12 }
  0x1a   :  { %p187_p11 = scmp.ne.s32.totalorder %s27_s12, %s186_s30  ;;  %p192_p13 = scmp.lt.s32.totalorder %s186_s30, %s186_s30 }
  0x1c   :  { %p193_p0 = por %p192_p13, %p191_p12 }
  0x1e   :  { %p194_p1 = pnand %p193_p0, %p187_p11 }
  0x20   :  { %197 = shalt.err (!%p194_p1)
}
  0x21   :  { %29 = dma.hbm_to_vmem [thread:$0]  %s283_s1, 128, %s27_s12, [#allocation6]  }
  0x22   :  { %220 = dma.done.wait [#allocation3], 64  }
  0x23   :  { %221 = vsyncadd [#allocation3], 4294967232 }
  0x24   :  { %222 = dma.done.wait [#allocation6], 128  }
  0x25   :  { %223 = vsyncadd [#allocation6], 4294967168  ;;  %v228_v0 = vmov 0.0   ;;  %vm229_vm0 = vmmov 0   ;;  %vm47_vm1 = vcmask 1043456   ;;  %vm43_vm2 = vcmask 31744  }
  0x26   :  { %144 = vmatprep.subr.mxu0 %v228_v0  ;;  %146 = vmatprep.mubr.msk.f32.mxu0 %vm229_vm0, %v228_v0  ;;  %v37_v1 = vld [vmem:[#allocation5] sm:$0xf]  ;;  %v36_v2 = vld [vmem:[#allocation2] sm:$0xf]  ;;  %v139_v3 = vld [vmem:[#allocation5 + $0x4] ss:$0 sm:$0xff] }
  0x27   :  { %145 = vmatpush3.msk.msra.mxu0 %vm47_vm1, %v37_v1  ;;  %s230_s4 = smov [#allocation7]   ;;  %vm121_vm3 = vcmask 60416  }
  0x28   :  { %147 = vmatmul.mubr.msk.f32.vlgmr.msra.gmra.mrb[0].mxu0 %vm43_vm2, %v36_v2  ;;  %s129_s5 = sshll.u32 %s230_s4, 4  ;;  %s130_s5 = int_to_ptr.vmem [resolvable:$true] %s129_s5 }
  0x29   :  { %s198_s1 = scalar_lea.vmem %s130_s5, 64  ;;  %p203_p3 = scmp.lt.s32.totalorder %s130_s5, %s130_s5 }
  0x2a   :  { %p199_p2 = scmp.ne.s32.totalorder %s130_s5, %s198_s1  ;;  %p204_p4 = scmp.lt.s32.totalorder %s198_s1, %s198_s1 }
  0x2c   :  { %p205_p5 = por %p204_p4, %p203_p3 }
  0x2e   :  { %p206_p6 = pnand %p205_p5, %p199_p2 }
  0xfb   :  { %v117_v4 = vpop.f32.mrb[0].mxu0 }
  0xfc   :  { %v118_v5 = vadd.f32 %v139_v3, %v117_v4  ;;  %v148_v6 = vpop.f32.mrb[1].mxu0 }
  0xfe   :  { %122 = vst.msk [vmem:[#allocation7] sm:$0xf] %vm121_vm3, %v118_v5 }
  0xff   :  { %209 = shalt.err (!%p206_p6)
}
 0x100   :  { %s210_s8 = scalar_lea.hbm %s284_s2, 64 }
 0x101   :  { %p211_p7 = scmp.ne.s32.totalorder %s284_s2, %s210_s8  ;;  %p214_p8 = scmp.lt.u32.totalorder %s210_s8, %s284_s2 }
 0x103   :  { %p216_p9 = pnand %p214_p8, %p211_p7 }
 0x105   :  { %219 = shalt.err (!%p216_p9)
}
 0x106   :  { %132 = dma.vmem_to_hbm [thread:$0]  %s130_s5, 64, %s284_s2, [#allocation4]  }
 0x107   :  { %224 = dma.done.wait [#allocation4], 64  }
 0x108   :  { %225 = vsyncadd [#allocation4], 4294967232 }
 0x109   :  { %136 = vsyncpa [#allocation3], 1 }
 0x10a   :  { %137 = vsyncpa [#allocation6], 1 }
 0x10b   :  { %138 = vsyncpa [#allocation4], 1 }

</bundles_post_ra>
